<compile_context>
chip_gen: v7x
topology: tpu7x:2x2x1
jax: 0.10.0
libtpu: 0.0.40
codegen_flags: <defaults>
</compile_context>

<pallas_src>
import jax
import jax.numpy as jnp
from jax.experimental import pallas as pl
from jax.experimental.pallas import tpu as pltpu


def mlp_kernel(x_ref, w1_ref, b1_ref, w2_ref, b2_ref, o_ref):
    """Full forward for one batch tile: sigmoid(x@W1+b1) @ W2 + b2."""
    # fc1 (MXU matmul, f32 accumulation) + bias
    h = jnp.dot(x_ref[...], w1_ref[...], preferred_element_type=jnp.float32) + b1_ref[...]

    # Sigmoid: exp/reciprocal go to the EUP slot, effectively free behind the matmuls.
    h = jax.nn.sigmoid(h)

    # fc (output projection, padded to 128 lanes) + bias
    out = jnp.dot(h, w2_ref[...], preferred_element_type=jnp.float32) + b2_ref[...]

    o_ref[...] = out.astype(o_ref.dtype)


def mynn_forward(x, w1, b1, w2, b2, *, bm=128):
    """x: [B, input_size]; w1: [input_size, hidden]; b1: [1, hidden];
    w2: [hidden, output]; b2: [1, output]."""
    B, in_dim = x.shape
    hid = w1.shape[1]
    out_dim = w2.shape[1]

    # Pad output columns to a multiple of 128 lanes so the output store is
    # unmasked (lane-dense). Zero padding of W2/b2 is exact; sliced off below.
    LANE = 128
    out_pad = ((out_dim + LANE - 1) // LANE) * LANE
    if out_pad != out_dim:
        w2 = jnp.pad(w2, ((0, 0), (0, out_pad - out_dim)))
        b2 = jnp.pad(b2, ((0, 0), (0, out_pad - out_dim)))

    if B <= bm:
        # Single invocation: whole problem lives in VMEM, no grid-step overhead.
        vmem_spec = pl.BlockSpec(memory_space=pltpu.MemorySpace.VMEM)
        out = pl.pallas_call(
            mlp_kernel,
            out_shape=jax.ShapeDtypeStruct((B, out_pad), jnp.float32),
            in_specs=[vmem_spec] * 5,
            out_specs=vmem_spec,
        )(x, w1, b1, w2, b2)
    else:
        # Large-batch path: tile only the batch axis; weights/biases stay resident.
        assert B % bm == 0, "batch must be divisible by the batch tile"
        grid = (B // bm,)
        out = pl.pallas_call(
            mlp_kernel,
            out_shape=jax.ShapeDtypeStruct((B, out_pad), jnp.float32),
            grid_spec=pltpu.PrefetchScalarGridSpec(
                num_scalar_prefetch=0,
                grid=grid,
                in_specs=[
                    pl.BlockSpec((bm, in_dim), lambda i: (i, 0)),     # x tile
                    pl.BlockSpec((in_dim, hid), lambda i: (0, 0)),    # W1 (resident)
                    pl.BlockSpec((1, hid), lambda i: (0, 0)),         # b1
                    pl.BlockSpec((hid, out_pad), lambda i: (0, 0)),   # W2 (resident, padded)
                    pl.BlockSpec((1, out_pad), lambda i: (0, 0)),     # b2 (padded)
                ],
                out_specs=pl.BlockSpec((bm, out_pad), lambda i: (i, 0)),
            ),
            compiler_params=pltpu.CompilerParams(
                dimension_semantics=("parallel",),  # lets v7x shard batch across its 2 TCs
            ),
        )(x, w1, b1, w2, b2)

    return out[:, :out_dim]


if __name__ == "__main__":
    # Small shapes consistent with the module's forward: flat feature vectors.
    batch = 16
    input_size = 16
    hidden_size = 32
    output_size = 8

    key = jax.random.PRNGKey(0)
    kx, kw1, kb1, kw2, kb2 = jax.random.split(key, 5)

    x = jax.random.normal(kx, (batch, input_size), dtype=jnp.float32)
    # Preprocessing from the script: x = x / x.max()  (plain-JAX glue)
    x = x / jnp.max(x)

    # Deterministic parameter init (PyTorch-Linear-like uniform bounds).
    bound1 = 1.0 / (input_size ** 0.5)
    bound2 = 1.0 / (hidden_size ** 0.5)
    # Stored already transposed: [in_features, out_features]
    w1 = jax.random.uniform(kw1, (input_size, hidden_size), jnp.float32, -bound1, bound1)
    b1 = jax.random.uniform(kb1, (1, hidden_size), jnp.float32, -bound1, bound1)
    w2 = jax.random.uniform(kw2, (hidden_size, output_size), jnp.float32, -bound2, bound2)
    b2 = jax.random.uniform(kb2, (1, output_size), jnp.float32, -bound2, bound2)

    out = mynn_forward(x, w1, b1, w2, b2)
    out = jax.block_until_ready(out)

    # Reference check in plain JAX (same math, outside the kernel).
    ref = jax.nn.sigmoid(x @ w1 + b1) @ w2 + b2
    assert out.shape == (batch, output_size)
    assert jnp.allclose(out, ref, atol=1e-5, rtol=1e-5), "mismatch vs reference"

    print("KERNEL_OK")
</pallas_src>

<mosaic_0001>
module attributes {stable_mosaic.version = 11 : i64} {
  func.func @mlp_kernel(%arg0: memref<16x16xf32, #tpu.memory_space<vmem>>, %arg1: memref<16x32xf32, #tpu.memory_space<vmem>>, %arg2: memref<1x32xf32, #tpu.memory_space<vmem>>, %arg3: memref<32x128xf32, #tpu.memory_space<vmem>>, %arg4: memref<1x128xf32, #tpu.memory_space<vmem>>, %arg5: memref<16x128xf32, #tpu.memory_space<vmem>>) attributes {dimension_semantics = [], scalar_prefetch = 0 : i64, scratch_operands = 0 : i64, tpu.core_type = #tpu.core_type<tc>} {
    %c0 = arith.constant 0 : index
    %c0_0 = arith.constant 0 : index
    %0 = vector.load %arg0[%c0, %c0_0] : memref<16x16xf32, #tpu.memory_space<vmem>>, vector<16x16xf32>
    %c0_1 = arith.constant 0 : index
    %c0_2 = arith.constant 0 : index
    %1 = vector.load %arg1[%c0_1, %c0_2] : memref<16x32xf32, #tpu.memory_space<vmem>>, vector<16x32xf32>
    %cst = arith.constant dense<0.000000e+00> : vector<16x32xf32>
    %2 = tpu.matmul %0, %1, %cst {dimension_numbers = #tpu.dot_dimension_numbers<[1], [0], [0], [1], [0, 0, 1, 1], [], []>} : vector<16x16xf32>, vector<16x32xf32>, vector<16x32xf32> -> vector<16x32xf32>
    %c0_3 = arith.constant 0 : index
    %c0_4 = arith.constant 0 : index
    %3 = vector.load %arg2[%c0_3, %c0_4] : memref<1x32xf32, #tpu.memory_space<vmem>>, vector<1x32xf32>
    %4 = vector.broadcast %3 : vector<1x32xf32> to vector<16x32xf32>
    %5 = arith.addf %2, %4 : vector<16x32xf32>
    %6 = arith.negf %5 : vector<16x32xf32>
    %7 = math.exp %6 : vector<16x32xf32>
    %cst_5 = arith.constant 1.000000e+00 : f32
    %8 = vector.broadcast %cst_5 : f32 to vector<16x32xf32>
    %9 = arith.addf %8, %7 : vector<16x32xf32>
    %10 = arith.divf %8, %9 : vector<16x32xf32>
    %c0_6 = arith.constant 0 : index
    %c0_7 = arith.constant 0 : index
    %11 = vector.load %arg3[%c0_6, %c0_7] : memref<32x128xf32, #tpu.memory_space<vmem>>, vector<32x128xf32>
    %cst_8 = arith.constant dense<0.000000e+00> : vector<16x128xf32>
    %12 = tpu.matmul %10, %11, %cst_8 {dimension_numbers = #tpu.dot_dimension_numbers<[1], [0], [0], [1], [0, 0, 1, 1], [], []>} : vector<16x32xf32>, vector<32x128xf32>, vector<16x128xf32> -> vector<16x128xf32>
    %c0_9 = arith.constant 0 : index
    %c0_10 = arith.constant 0 : index
    %13 = vector.load %arg4[%c0_9, %c0_10] : memref<1x128xf32, #tpu.memory_space<vmem>>, vector<1x128xf32>
    %14 = vector.broadcast %13 : vector<1x128xf32> to vector<16x128xf32>
    %15 = arith.addf %12, %14 : vector<16x128xf32>
    %c0_11 = arith.constant 0 : index
    %c0_12 = arith.constant 0 : index
    %16 = vector.load %arg5[%c0_11, %c0_12] : memref<16x128xf32, #tpu.memory_space<vmem>>, vector<16x128xf32>
    tpu.vector_store %arg5[%c0_11, %c0_12], %15 {strides = array<i32>} : memref<16x128xf32, #tpu.memory_space<vmem>>, vector<16x128xf32>,
    return
  }
}

</mosaic_0001>

<bundles_post_ra>
// kernel: tpu_custom_call.1
= control target key start
LH: loop header
LB: loop body
LE: loop exit
PB: predicated region body
PF: predicated region fallthrough
CT: control target
= control target key end

     0   :  { %10 = vsyncpa [#allocation3], 0  ;;  %s545_s0 = inlined_call_operand.hbm [shape: f32[16,16], index: 0, kind: input, shape index: {}]   ;;  %s546_s1 = inlined_call_operand.hbm [shape: f32[16,32], index: 1, kind: input, shape index: {}]   ;;  %s547_s2 = inlined_call_operand.vmem [shape: f32[1,32], index: 2, kind: input, shape index: {}]   ;;  %s548_s3 = inlined_call_operand.hbm [shape: f32[32,128], index: 3, kind: input, shape index: {}]   ;;  %s549_s4 = inlined_call_operand.vmem [shape: f32[1,128], index: 4, kind: input, shape index: {}]   ;;  %s550_s5 = inlined_call_operand.hbm [shape: f32[16,128], index: 5, kind: output, shape index: {}]  }
   0x1   :  { %11 = vsyncpa [#allocation6], 0 }
   0x2   :  { %12 = vsyncpa [#allocation4], 0  ;;  %s436_s18 = smov [#allocation5]   ;;  %s437_s20 = smov [#allocation2]  }
   0x3   :  { %s30_s19 = sshll.u32 %s436_s18, 4  ;;  %s18_s21 = sshll.u32 %s437_s20, 4  ;;  %s31_s19 = int_to_ptr.vmem [resolvable:$true] %s30_s19  ;;  %s472_s21 = int_to_ptr.vmem [resolvable:$true] %s18_s21 }
   0x4   :  { %s342_s24 = scalar_lea.hbm %s546_s1, 256 }
   0x5   :  { %p343_p0 = scmp.ne.s32.totalorder %s546_s1, %s342_s24  ;;  %p346_p1 = scmp.lt.u32.totalorder %s342_s24, %s546_s1 }
   0x7   :  { %p348_p2 = pnand %p346_p1, %p343_p0 }
   0x9   :  { %351 = shalt.err (!%p348_p2)
}
   0xa   :  { %s352_s29 = scalar_lea.vmem %s31_s19, 256  ;;  %p357_p4 = scmp.lt.s32.totalorder %s31_s19, %s31_s19 }
   0xb   :  { %p353_p3 = scmp.ne.s32.totalorder %s31_s19, %s352_s29  ;;  %p358_p5 = scmp.lt.s32.totalorder %s352_s29, %s352_s29 }
   0xd   :  { %p359_p6 = por %p358_p5, %p357_p4 }
   0xf   :  { %p360_p7 = pnand %p359_p6, %p353_p3 }
  0x11   :  { %363 = shalt.err (!%p360_p7)
}
  0x12   :  { %s438_s30 = smov 128   ;;  %s439_s6 = smov 8  }
  0x13   :  { %36 = dma.hbm_to_vmem [thread:$0]  %s546_s1, 256, %s31_s19, [#allocation6], %s438_s30, %s438_s30, %s439_s6  }
  0x14   :  { %s364_s11 = scalar_lea.hbm %s545_s0, 256 }
  0x15   :  { %p365_p8 = scmp.ne.s32.totalorder %s545_s0, %s364_s11  ;;  %p368_p9 = scmp.lt.u32.totalorder %s364_s11, %s545_s0 }
  0x17   :  { %p370_p10 = pnand %p368_p9, %p365_p8 }
  0x19   :  { %373 = shalt.err (!%p370_p10)
}
  0x1a   :  { %s374_s16 = scalar_lea.vmem %s472_s21, 256  ;;  %p379_p12 = scmp.lt.s32.totalorder %s472_s21, %s472_s21 }
  0x1b   :  { %p375_p11 = scmp.ne.s32.totalorder %s472_s21, %s374_s16  ;;  %p380_p13 = scmp.lt.s32.totalorder %s374_s16, %s374_s16 }
  0x1d   :  { %p381_p0 = por %p380_p13, %p379_p12 }
  0x1f   :  { %p382_p1 = pnand %p381_p0, %p375_p11 }
  0x21   :  { %385 = shalt.err (!%p382_p1)
}
  0x22   :  { %24 = dma.hbm_to_vmem [thread:$0]  %s545_s0, 256, %s472_s21, [#allocation3], %s438_s30, %s438_s30, %s439_s6  }
  0x23   :  { %s440_s18 = smov [#allocation7]   ;;  %s386_s23 = scalar_lea.hbm %s548_s3, 512 }
  0x24   :  { %s44_s19 = sshll.u32 %s440_s18, 4  ;;  %p387_p2 = scmp.ne.s32.totalorder %s548_s3, %s386_s23  ;;  %s45_s19 = int_to_ptr.vmem [resolvable:$true] %s44_s19 }
  0x25   :  { %p390_p3 = scmp.lt.u32.totalorder %s386_s23, %s548_s3 }
  0x27   :  { %p392_p4 = pnand %p390_p3, %p387_p2 }
  0x29   :  { %395 = shalt.err (!%p392_p4)
}
  0x2a   :  { %s396_s28 = scalar_lea.vmem %s45_s19, 512  ;;  %p401_p6 = scmp.lt.s32.totalorder %s45_s19, %s45_s19 }
  0x2b   :  { %p397_p5 = scmp.ne.s32.totalorder %s45_s19, %s396_s28  ;;  %p402_p7 = scmp.lt.s32.totalorder %s396_s28, %s396_s28 }
  0x2d   :  { %p403_p8 = por %p402_p7, %p401_p6 }
  0x2f   :  { %p404_p9 = pnand %p403_p8, %p397_p5 }
  0x31   :  { %407 = shalt.err (!%p404_p9)
}
  0x32   :  { %50 = dma.hbm_to_vmem [thread:$0]  %s548_s3, 512, %s45_s19, [#allocation6], %s438_s30, %s438_s30, %s439_s6  }
  0x33   :  { %430 = dma.done.wait [#allocation3], 256  }
  0x34   :  { %431 = vsyncadd [#allocation3], 4294967040 }
  0x35   :  { %432 = dma.done.wait [#allocation6], 768  }
  0x36   :  { %433 = vsyncadd [#allocation6], 4294966528  ;;  %vm73_vm0 = vcmask 130048   ;;  %v64_v0 = vld [vmem:[#allocation5] sm:$0xff]  ;;  %v65_v1 = vld [vmem:[#allocation5 + $0x8] sm:$0xff]  ;;  %vm178_vm1 = vcmask 261120  }
  0x37   :  { %v62_v2 = vld [vmem:[#allocation2] sm:$0xff]  ;;  %v316_v3 = vpack.c.bf16 %v65_v1, %v64_v0  ;;  %v63_v4 = vld [vmem:[#allocation2 + $0x8] sm:$0xff]  ;;  %v169_v7 = vld [vmem:[#allocation7 + $0x10] sm:$0xff]  ;;  %s441_s8 = smov [#allocation8]  }
  0x38   :  { %302 = vmatprep.mubr.msk.f32.mxu0 %vm73_vm0, %v62_v2  ;;  %v167_v5 = vld [vmem:[#allocation7] sm:$0xff]  ;;  %v168_v6 = vld [vmem:[#allocation7 + $0x8] sm:$0xff]  ;;  %v170_v9 = vld [vmem:[#allocation7 + $0x18] sm:$0xff]  ;;  %s267_s9 = sshll.u32 %s441_s8, 4  ;;  %s268_s9 = int_to_ptr.vmem [resolvable:$true] %s267_s9 }
  0x39   :  { %317 = vmatprep.subr.bf16.mxu0 %v316_v3  ;;  %v320_v8 = vpack.c.bf16 %v168_v6, %v167_v5  ;;  %v324_v10 = vpack.c.bf16 %v170_v9, %v169_v7  ;;  %v280_v11 = vld [vmem:[%s547_s2] ss:$0 sm:$0xff]  ;;  %s408_s10 = scalar_lea.vmem %s268_s9, 256  ;;  %p413_p11 = scmp.lt.s32.totalorder %s268_s9, %s268_s9 }
  0x3a   :  { %319 = vmatpush3.bf16.msra.mxu0 %v316_v3  ;;  %v285_v24 = vld [vmem:[%s549_s4] ss:$0 sm:$0xff]  ;;  %p409_p10 = scmp.ne.s32.totalorder %s268_s9, %s408_s10  ;;  %p414_p12 = scmp.lt.s32.totalorder %s408_s10, %s408_s10 }
  0x3b   :  { %321 = vmatprep.subr.bf16.mxu1 %v320_v8 }
  0x3c   :  { %323 = vmatpush3.bf16.msra.mxu1 %v320_v8  ;;  %p415_p13 = por %p414_p12, %p413_p11 }
  0x3d   :  { %303 = vmatmul.mubr.msk.f32.vlgmr.msra.gmra.mrb[0].mxu0 %vm73_vm0, %v63_v4  ;;  %325 = vmatprep.subr.bf16.mxu1 %v324_v10 }
  0x3e   :  { %p416_p0 = pnand %p415_p13, %p409_p10 }
  0x40   :  { %327 = vmatpush3.bf16.msra.mxu1 %v324_v10 }
 0x110   :  { %v304_v12 = vpop.f32.mrb[0].mxu0 }
 0x111   :  { %v152_v13 = vadd.f32 %v304_v12, %v280_v11  ;;  %v146_v14 = vpop.f32.mrb[1].mxu0 }
 0x112   :  { %v147_v15 = vadd.f32 %v280_v11, %v146_v14 }
 0x113   :  { %v284_v16 = vmul.f32 -1.442695, %v152_v13 }
 0x114   :  { %v283_v17 = vmul.f32 -1.442695, %v147_v15 }
 0x115   :  { %334 = vpow2.f32 %v284_v16 }
 0x116   :  { %336 = vpow2.f32 %v283_v17 }
 0x11f   :  { %v335_v18 = vpop.eup %334 }
 0x120   :  { %v337_v19 = vpop.eup %336  ;;  %v162_v20 = vadd.f32 1.0, %v335_v18 }
 0x121   :  { %v161_v21 = vadd.f32 1.0, %v337_v19 }
 0x123   :  { %338 = vrcp.f32 %v161_v21 }
 0x124   :  { %340 = vrcp.f32 %v162_v20 }
 0x12d   :  { %v339_v22 = vpop.eup %338 }
 0x12e   :  { %v341_v23 = vpop.eup %340  ;;  %313 = vmatprep.mubr.msk.f32.mxu1 %vm178_vm1, %v339_v22 }
 0x12f   :  { %314 = vmatmul.mubr.msk.f32.vlgmr.msra.gmra.mrb[0].mxu1 %vm178_vm1, %v341_v23 }
 0x202   :  { %v315_v25 = vpop.f32.mrb[0].mxu1 }
 0x203   :  { %v257_v26 = vadd.f32 %v315_v25, %v285_v24  ;;  %v251_v27 = vpop.f32.mrb[1].mxu1 }
 0x204   :  { %v252_v28 = vadd.f32 %v285_v24, %v251_v27 }
 0x205   :  { %261 = vst [vmem:[#allocation8 + $0x8] sm:$0xff] %v257_v26 }
 0x206   :  { %260 = vst [vmem:[#allocation8] sm:$0xff] %v252_v28 }
 0x207   :  { %419 = shalt.err (!%p416_p0)
}
 0x208   :  { %s420_s4 = scalar_lea.hbm %s550_s5, 256 }
 0x209   :  { %p421_p1 = scmp.ne.s32.totalorder %s550_s5, %s420_s4  ;;  %p424_p2 = scmp.lt.u32.totalorder %s420_s4, %s550_s5 }
 0x20b   :  { %p426_p3 = pnand %p424_p2, %p421_p1 }
 0x20d   :  { %429 = shalt.err (!%p426_p3)
}
 0x20e   :  { %273 = dma.vmem_to_hbm [thread:$0]  %s268_s9, 256, %s550_s5, [#allocation4], %s438_s30, %s438_s30, %s439_s6  }
 0x20f   :  { %434 = dma.done.wait [#allocation4], 256  }
 0x210   :  { %435 = vsyncadd [#allocation4], 4294967040 }
 0x211   :  { %277 = vsyncpa [#allocation3], 1 }
 0x212   :  { %278 = vsyncpa [#allocation6], 1 }
 0x213   :  { %279 = vsyncpa [#allocation4], 1 }

</bundles_post_ra>
